<compile_context>
chip_gen: v6e
topology: v6e:2x2x1
jax: 0.10.0
libtpu: 0.0.40
codegen_flags: <defaults>
</compile_context>

<pallas_src>
import jax
import jax.numpy as jnp
from jax.experimental import pallas as pl
from jax.experimental.pallas import tpu as pltpu

# Padded (lane-aligned) dims.
D_IN, D_H1, D_H2, D_OUT = 128, 256, 384, 128


def _round_up(n, m):
    return ((n + m - 1) // m) * m


def _pad_to(a, shape):
    return jnp.pad(a, [(0, t - s) for s, t in zip(a.shape, shape)])


def mlp_kernel(x_ref, w1_ref, b1_ref, w2_ref, b2_ref, w3_ref, b3_ref, o_ref):
    # fc1 + ReLU   (bf16 MXU inputs, f32 accumulate, f32 VPU elementwise)
    x = x_ref[...].astype(jnp.bfloat16)
    h1 = jnp.dot(x, w1_ref[...], preferred_element_type=jnp.float32)
    h1 = jnp.maximum(h1 + b1_ref[...], 0.0)
    # fc2 + ReLU
    h2 = jnp.dot(h1.astype(jnp.bfloat16), w2_ref[...],
                 preferred_element_type=jnp.float32)
    h2 = jnp.maximum(h2 + b2_ref[...], 0.0)
    # fc3 (lane-dense padded output, real result lives in lane 0)
    out = jnp.dot(h2.astype(jnp.bfloat16), w3_ref[...],
                  preferred_element_type=jnp.float32)
    o_ref[...] = (out + b3_ref[...]).astype(o_ref.dtype)


def pack_params(params):
    """Zero-pad params to lane-aligned shapes; weights -> bf16, biases stay f32.
    Padded weight rows/cols and bias lanes are zero, so padded hidden lanes
    contribute nothing (ReLU(0)=0 and padded W rows are zero)."""
    w1 = _pad_to(params["w1"], (D_IN, D_H1)).astype(jnp.bfloat16)
    b1 = _pad_to(params["b1"], (1, D_H1)).astype(jnp.float32)
    w2 = _pad_to(params["w2"], (D_H1, D_H2)).astype(jnp.bfloat16)
    b2 = _pad_to(params["b2"], (1, D_H2)).astype(jnp.float32)
    w3 = _pad_to(params["w3"], (D_H2, D_OUT)).astype(jnp.bfloat16)
    b3 = _pad_to(params["b3"], (1, D_OUT)).astype(jnp.float32)
    return w1, b1, w2, b2, w3, b3


def mlp_forward(x, params, tb=512):
    """x: (B, 91) f32 -> (B, 1) f32."""
    B = x.shape[0]
    # Batch tile: large (>=512) when batch is big to amortize per-step overhead,
    # otherwise just the (sublane-aligned) batch itself -> grid of 1.
    TB = min(tb, _round_up(B, 8))
    B_pad = _round_up(B, TB)
    nb = B_pad // TB

    x_pad = _pad_to(x.astype(jnp.float32), (B_pad, D_IN))
    w1, b1, w2, b2, w3, b3 = pack_params(params)

    resident = lambda a: pl.BlockSpec(a.shape, lambda i: (0, 0))

    out_pad = pl.pallas_call(
        mlp_kernel,
        out_shape=jax.ShapeDtypeStruct((B_pad, D_OUT), jnp.float32),
        grid=(nb,),
        in_specs=[
            pl.BlockSpec((TB, D_IN), lambda i: (i, 0)),   # x: tiled over batch
            resident(w1), resident(b1),                   # weights: VMEM-resident
            resident(w2), resident(b2),
            resident(w3), resident(b3),
        ],
        out_specs=pl.BlockSpec((TB, D_OUT), lambda i: (i, 0)),
        compiler_params=pltpu.CompilerParams(
            dimension_semantics=("parallel",),            # v7x: shard batch over 2 TCs
        ),
    )(x_pad, w1, b1, w2, b2, w3, b3)

    # Lane-dense write inside the kernel; free XLA slice back to (B, 1) here.
    return out_pad[:B, :1]


def init_params(key):
    """PyTorch nn.Linear default init (uniform +/- 1/sqrt(fan_in)).
    Weights stored as (in, out) = PyTorch weight transposed."""
    dims = [(91, 182), (182, 364), (364, 1)]
    params = {}
    keys = jax.random.split(key, 2 * len(dims))
    for i, (fan_in, fan_out) in enumerate(dims):
        bound = 1.0 / (fan_in ** 0.5)
        params[f"w{i + 1}"] = jax.random.uniform(
            keys[2 * i], (fan_in, fan_out), minval=-bound, maxval=bound,
            dtype=jnp.float32)
        params[f"b{i + 1}"] = jax.random.uniform(
            keys[2 * i + 1], (1, fan_out), minval=-bound, maxval=bound,
            dtype=jnp.float32)
    return params


def mlp_reference(x, params):
    """Pure-JAX reference mirroring the kernel's bf16-input / f32-accumulate dots."""
    bf = jnp.bfloat16
    h1 = jnp.dot(x.astype(bf), params["w1"].astype(bf),
                 preferred_element_type=jnp.float32) + params["b1"]
    h1 = jnp.maximum(h1, 0.0)
    h2 = jnp.dot(h1.astype(bf), params["w2"].astype(bf),
                 preferred_element_type=jnp.float32) + params["b2"]
    h2 = jnp.maximum(h2, 0.0)
    out = jnp.dot(h2.astype(bf), params["w3"].astype(bf),
                  preferred_element_type=jnp.float32) + params["b3"]
    return out


if __name__ == "__main__":
    key = jax.random.PRNGKey(0)
    k_x, k_p = jax.random.split(key)

    B = 8  # small batch
    x = jax.random.normal(k_x, (B, 91), dtype=jnp.float32)
    params = init_params(k_p)

    out = mlp_forward(x, params)
    out = jax.block_until_ready(out)

    ref = mlp_reference(x, params)
    assert out.shape == (B, 1), out.shape
    assert jnp.allclose(out, ref, atol=1e-3, rtol=1e-3), "mismatch vs JAX reference"

    print("KERNEL_OK")
</pallas_src>

<mosaic_0001>
module attributes {stable_mosaic.version = 11 : i64} {
  func.func @mlp_kernel(%arg0: i32, %arg1: memref<8x128xf32, #tpu.memory_space<vmem>>, %arg2: memref<128x256xbf16, #tpu.memory_space<vmem>>, %arg3: memref<1x256xf32, #tpu.memory_space<vmem>>, %arg4: memref<256x384xbf16, #tpu.memory_space<vmem>>, %arg5: memref<1x384xf32, #tpu.memory_space<vmem>>, %arg6: memref<384x128xbf16, #tpu.memory_space<vmem>>, %arg7: memref<1x128xf32, #tpu.memory_space<vmem>>, %arg8: memref<8x128xf32, #tpu.memory_space<vmem>>) attributes {dimension_semantics = [#tpu.dimension_semantics<parallel>], iteration_bounds = array<i64: 1>, scalar_prefetch = 0 : i64, scratch_operands = 0 : i64, tpu.core_type = #tpu.core_type<tc>, window_params = [{transform_indices = @transform_0, window_bounds = array<i64: 8, 128>}, {pipeline_mode = #tpu.pipeline_mode<synchronous>, transform_indices = @transform_1, window_bounds = array<i64: 128, 256>}, {pipeline_mode = #tpu.pipeline_mode<synchronous>, transform_indices = @transform_2, window_bounds = array<i64: 1, 256>}, {pipeline_mode = #tpu.pipeline_mode<synchronous>, transform_indices = @transform_3, window_bounds = array<i64: 256, 384>}, {pipeline_mode = #tpu.pipeline_mode<synchronous>, transform_indices = @transform_4, window_bounds = array<i64: 1, 384>}, {pipeline_mode = #tpu.pipeline_mode<synchronous>, transform_indices = @transform_5, window_bounds = array<i64: 384, 128>}, {pipeline_mode = #tpu.pipeline_mode<synchronous>, transform_indices = @transform_6, window_bounds = array<i64: 1, 128>}, {transform_indices = @transform_7, window_bounds = array<i64: 8, 128>}]} {
    %c0 = arith.constant 0 : index
    %c0_0 = arith.constant 0 : index
    %0 = vector.load %arg1[%c0, %c0_0] : memref<8x128xf32, #tpu.memory_space<vmem>>, vector<8x128xf32>
    %1 = arith.truncf %0 : vector<8x128xf32> to vector<8x128xbf16>
    %c0_1 = arith.constant 0 : index
    %c0_2 = arith.constant 0 : index
    %2 = vector.load %arg2[%c0_1, %c0_2] : memref<128x256xbf16, #tpu.memory_space<vmem>>, vector<128x256xbf16>
    %cst = arith.constant dense<0.000000e+00> : vector<8x256xf32>
    %3 = tpu.matmul %1, %2, %cst {dimension_numbers = #tpu.dot_dimension_numbers<[1], [0], [0], [1], [0, 0, 1, 1], [], []>} : vector<8x128xbf16>, vector<128x256xbf16>, vector<8x256xf32> -> vector<8x256xf32>
    %c0_3 = arith.constant 0 : index
    %c0_4 = arith.constant 0 : index
    %4 = vector.load %arg3[%c0_3, %c0_4] : memref<1x256xf32, #tpu.memory_space<vmem>>, vector<1x256xf32>
    %5 = vector.broadcast %4 : vector<1x256xf32> to vector<8x256xf32>
    %6 = arith.addf %3, %5 : vector<8x256xf32>
    %cst_5 = arith.constant 0.000000e+00 : f32
    %7 = vector.broadcast %cst_5 : f32 to vector<8x256xf32>
    %8 = arith.maximumf %6, %7 : vector<8x256xf32>
    %9 = arith.truncf %8 : vector<8x256xf32> to vector<8x256xbf16>
    %c0_6 = arith.constant 0 : index
    %c0_7 = arith.constant 0 : index
    %10 = vector.load %arg4[%c0_6, %c0_7] : memref<256x384xbf16, #tpu.memory_space<vmem>>, vector<256x384xbf16>
    %cst_8 = arith.constant dense<0.000000e+00> : vector<8x384xf32>
    %11 = tpu.matmul %9, %10, %cst_8 {dimension_numbers = #tpu.dot_dimension_numbers<[1], [0], [0], [1], [0, 0, 1, 1], [], []>} : vector<8x256xbf16>, vector<256x384xbf16>, vector<8x384xf32> -> vector<8x384xf32>
    %c0_9 = arith.constant 0 : index
    %c0_10 = arith.constant 0 : index
    %12 = vector.load %arg5[%c0_9, %c0_10] : memref<1x384xf32, #tpu.memory_space<vmem>>, vector<1x384xf32>
    %13 = vector.broadcast %12 : vector<1x384xf32> to vector<8x384xf32>
    %14 = arith.addf %11, %13 : vector<8x384xf32>
    %cst_11 = arith.constant 0.000000e+00 : f32
    %15 = vector.broadcast %cst_11 : f32 to vector<8x384xf32>
    %16 = arith.maximumf %14, %15 : vector<8x384xf32>
    %17 = arith.truncf %16 : vector<8x384xf32> to vector<8x384xbf16>
    %c0_12 = arith.constant 0 : index
    %c0_13 = arith.constant 0 : index
    %18 = vector.load %arg6[%c0_12, %c0_13] : memref<384x128xbf16, #tpu.memory_space<vmem>>, vector<384x128xbf16>
    %cst_14 = arith.constant dense<0.000000e+00> : vector<8x128xf32>
    %19 = tpu.matmul %17, %18, %cst_14 {dimension_numbers = #tpu.dot_dimension_numbers<[1], [0], [0], [1], [0, 0, 1, 1], [], []>} : vector<8x384xbf16>, vector<384x128xbf16>, vector<8x128xf32> -> vector<8x128xf32>
    %c0_15 = arith.constant 0 : index
    %c0_16 = arith.constant 0 : index
    %20 = vector.load %arg7[%c0_15, %c0_16] : memref<1x128xf32, #tpu.memory_space<vmem>>, vector<1x128xf32>
    %21 = vector.broadcast %20 : vector<1x128xf32> to vector<8x128xf32>
    %22 = arith.addf %19, %21 : vector<8x128xf32>
    %c0_17 = arith.constant 0 : index
    %c0_18 = arith.constant 0 : index
    %23 = vector.load %arg8[%c0_17, %c0_18] : memref<8x128xf32, #tpu.memory_space<vmem>>, vector<8x128xf32>
    tpu.vector_store %arg8[%c0_17, %c0_18], %22 {strides = array<i32>} : memref<8x128xf32, #tpu.memory_space<vmem>>, vector<8x128xf32>,
    return
  }
  func.func @transform_0(%arg0: i32) -> (i32, i32) {
    %c0_i32 = arith.constant 0 : i32
    %c0_i32_0 = arith.constant 0 : i32
    return %arg0, %c0_i32 : i32, i32
  }
  func.func @transform_1(%arg0: i32) -> (i32, i32) {
    %c0_i32 = arith.constant 0 : i32
    %c0_i32_0 = arith.constant 0 : i32
    %c0_i32_1 = arith.constant 0 : i32
    return %c0_i32, %c0_i32_0 : i32, i32
  }
  func.func @transform_2(%arg0: i32) -> (i32, i32) {
    %c0_i32 = arith.constant 0 : i32
    %c0_i32_0 = arith.constant 0 : i32
    %c0_i32_1 = arith.constant 0 : i32
    return %c0_i32, %c0_i32_0 : i32, i32
  }
  func.func @transform_3(%arg0: i32) -> (i32, i32) {
    %c0_i32 = arith.constant 0 : i32
    %c0_i32_0 = arith.constant 0 : i32
    %c0_i32_1 = arith.constant 0 : i32
    return %c0_i32, %c0_i32_0 : i32, i32
  }
  func.func @transform_4(%arg0: i32) -> (i32, i32) {
    %c0_i32 = arith.constant 0 : i32
    %c0_i32_0 = arith.constant 0 : i32
    %c0_i32_1 = arith.constant 0 : i32
    return %c0_i32, %c0_i32_0 : i32, i32
  }
  func.func @transform_5(%arg0: i32) -> (i32, i32) {
    %c0_i32 = arith.constant 0 : i32
    %c0_i32_0 = arith.constant 0 : i32
    %c0_i32_1 = arith.constant 0 : i32
    return %c0_i32, %c0_i32_0 : i32, i32
  }
  func.func @transform_6(%arg0: i32) -> (i32, i32) {
    %c0_i32 = arith.constant 0 : i32
    %c0_i32_0 = arith.constant 0 : i32
    %c0_i32_1 = arith.constant 0 : i32
    return %c0_i32, %c0_i32_0 : i32, i32
  }
  func.func @transform_7(%arg0: i32) -> (i32, i32) {
    %c0_i32 = arith.constant 0 : i32
    %c0_i32_0 = arith.constant 0 : i32
    return %arg0, %c0_i32 : i32, i32
  }
}

</mosaic_0001>

<bundles_post_ra>
// kernel: tpu_custom_call.1
= control target key start
LH: loop header
LB: loop body
LE: loop exit
PB: predicated region body
PF: predicated region fallthrough
CT: control target
= control target key end

     0   :  { %12 = vsyncpa [#allocation3], 0  ;;  %s1453_s0 = inlined_call_operand.hbm [shape: f32[8,128], index: 0, kind: input, shape index: {}]   ;;  %s1454_s1 = inlined_call_operand.hbm [shape: bf16[128,256], index: 1, kind: input, shape index: {}]   ;;  %s1455_s2 = inlined_call_operand.vmem [shape: f32[1,256], index: 2, kind: input, shape index: {}]   ;;  %s1456_s3 = inlined_call_operand.hbm [shape: bf16[256,384], index: 3, kind: input, shape index: {}]   ;;  %s1457_s4 = inlined_call_operand.vmem [shape: f32[1,384], index: 4, kind: input, shape index: {}]   ;;  %s1458_s5 = inlined_call_operand.hbm [shape: bf16[384,128], index: 5, kind: input, shape index: {}]   ;;  %s1459_s6 = inlined_call_operand.vmem [shape: f32[1,128], index: 6, kind: input, shape index: {}]   ;;  %s1460_s7 = inlined_call_operand.hbm [shape: f32[8,128], index: 7, kind: output, shape index: {}]  }
   0x1   :  { %13 = vsyncpa [#allocation6], 0 }
   0x2   :  { %14 = vsyncpa [#allocation9], 0 }
   0x3   :  { %15 = vsyncpa [#allocation4], 0  ;;  %s1353_s24 = smov [#allocation5]  }
   0x4   :  { %s31_s25 = sshll.u32 %s1353_s24, 4  ;;  %s32_s25 = int_to_ptr.vmem [resolvable:$true] %s31_s25 }
   0x5   :  { %s1253_s26 = scalar_lea.vmem %s32_s25, 2048  ;;  %p1258_p1 = scmp.lt.s32.totalorder %s32_s25, %s32_s25 }
   0x6   :  { %p1254_p0 = scmp.ne.s32.totalorder %s32_s25, %s1253_s26  ;;  %p1259_p2 = scmp.lt.s32.totalorder %s1253_s26, %s1253_s26 }
   0x8   :  { %p1260_p3 = por %p1259_p2, %p1258_p1 }
   0xa   :  { %p1261_p4 = pnand %p1260_p3, %p1254_p0 }
   0xc   :  { %1264 = shalt.err (!%p1261_p4)
}
   0xd   :  { %s1354_s27 = smov 128   ;;  %s1355_s28 = smov 8  }
   0xe   :  { %37 = dma.hbm_to_vmem [thread:$0]  %s1454_s1, 2048, %s32_s25, [#allocation6], %s1354_s27, %s1354_s27, %s1355_s28  }
   0xf   :  { %s1356_s8 = smov [#allocation2]   ;;  %s1357_s10 = smov [#allocation7]  }
  0x10   :  { %s22_s9 = sshll.u32 %s1356_s8, 4  ;;  %s45_s11 = sshll.u32 %s1357_s10, 4  ;;  %s23_s9 = int_to_ptr.vmem [resolvable:$true] %s22_s9  ;;  %s46_s11 = int_to_ptr.vmem [resolvable:$true] %s45_s11 }
  0x11   :  { %s1273_s12 = scalar_lea.vmem %s23_s9, 128  ;;  %p1278_p6 = scmp.lt.s32.totalorder %s23_s9, %s23_s9 }
  0x12   :  { %p1274_p5 = scmp.ne.s32.totalorder %s23_s9, %s1273_s12  ;;  %p1279_p7 = scmp.lt.s32.totalorder %s1273_s12, %s1273_s12 }
  0x14   :  { %p1280_p8 = por %p1279_p7, %p1278_p6 }
  0x16   :  { %p1281_p9 = pnand %p1280_p8, %p1274_p5 }
  0x18   :  { %1284 = shalt.err (!%p1281_p9)
}
  0x19   :  { %25 = dma.hbm_to_vmem [thread:$0]  %s1453_s0, 128, %s23_s9, [#allocation3]  }
  0x1a   :  { %s1293_s15 = scalar_lea.vmem %s46_s11, 6144  ;;  %p1298_p11 = scmp.lt.s32.totalorder %s46_s11, %s46_s11 }
  0x1b   :  { %p1294_p10 = scmp.ne.s32.totalorder %s46_s11, %s1293_s15  ;;  %p1299_p12 = scmp.lt.s32.totalorder %s1293_s15, %s1293_s15 }
  0x1d   :  { %p1300_p13 = por %p1299_p12, %p1298_p11 }
  0x1f   :  { %p1301_p0 = pnand %p1300_p13, %p1294_p10 }
  0x21   :  { %1304 = shalt.err (!%p1301_p0)
}
  0x22   :  { %s1358_s1 = smov 192   ;;  %s1359_s16 = smov 12  }
  0x23   :  { %51 = dma.hbm_to_vmem [thread:$0]  %s1456_s3, 6144, %s46_s11, [#allocation6], %s1358_s1, %s1358_s1, %s1359_s16  }
  0x24   :  { %s1360_s19 = smov [#allocation8]  }
  0x25   :  { %s59_s20 = sshll.u32 %s1360_s19, 4  ;;  %s60_s20 = int_to_ptr.vmem [resolvable:$true] %s59_s20 }
  0x26   :  { %s1313_s21 = scalar_lea.vmem %s60_s20, 3072  ;;  %p1318_p2 = scmp.lt.s32.totalorder %s60_s20, %s60_s20 }
  0x27   :  { %p1314_p1 = scmp.ne.s32.totalorder %s60_s20, %s1313_s21  ;;  %p1319_p3 = scmp.lt.s32.totalorder %s1313_s21, %s1313_s21 }
  0x29   :  { %p1320_p4 = por %p1319_p3, %p1318_p2 }
  0x2b   :  { %p1321_p5 = pnand %p1320_p4, %p1314_p1 }
  0x2d   :  { %1324 = shalt.err (!%p1321_p5)
}
  0x2e   :  { %s1361_s0 = smov 64   ;;  %s1362_s22 = smov 4  }
  0x2f   :  { %65 = dma.hbm_to_vmem [thread:$0]  %s1458_s5, 3072, %s60_s20, [#allocation9], %s1361_s0, %s1361_s0, %s1362_s22  }
  0x30   :  { %1345 = dma.done.wait [#allocation3], 128  }
  0x31   :  { %1346 = vsyncadd [#allocation3], 4294967168 }
  0x32   :  { %1347 = dma.done.wait [#allocation6], 8192  }
  0x33   :  { %1348 = vsyncadd [#allocation6], 4294959104 }
  0x34   :  { %1349 = dma.done.wait [#allocation9], 3072  }
  0x35   :  { %1350 = vsyncadd [#allocation9], 4294964224  ;;  %v1363_v0 = vmov 0   ;;  %v1133_v1 = vld [vmem:[#allocation5 + $0x74] ss:$8 sps:$4 sm:$0xff]   ;;  %vm1365_vm0 = vmmov 0  }
  0x36   :  { %223 = vmatprep.mubr.bf16.mxu0 %v1363_v0  ;;  %v1135_v2 = vld [vmem:[#allocation5 + $0x70] ss:$8 sps:$4 sm:$0xff]   ;;  %191 = vmatprep.subr.bf16.mxu0 %v1133_v1  ;;  %v1136_v3 = vld [vmem:[#allocation5 + $0x64] ss:$8 sps:$4 sm:$0xff]   ;;  %v1138_v4 = vld [vmem:[#allocation5 + $0x60] ss:$8 sps:$4 sm:$0xff]  }
  0x37   :  { %192 = vmatpush1.bf16.msra.mxu0 %v1135_v2  ;;  %v1139_v5 = vld [vmem:[#allocation5 + $0x54] ss:$8 sps:$4 sm:$0xff]   ;;  %v1141_v6 = vld [vmem:[#allocation5 + $0x50] ss:$8 sps:$4 sm:$0xff]   ;;  %v1142_v7 = vld [vmem:[#allocation5 + $0x44] ss:$8 sps:$4 sm:$0xff]  }
  0x38   :  { %193 = vmatprep.subr.bf16.mxu0 %v1136_v3  ;;  %v1144_v8 = vld [vmem:[#allocation5 + $0x40] ss:$8 sps:$4 sm:$0xff]   ;;  %v1145_v9 = vld [vmem:[#allocation5 + $0x34] ss:$8 sps:$4 sm:$0xff]   ;;  %v1157_v10 = vld [vmem:[#allocation7 + $0xac] ss:$12 sps:$4 sm:$0xff]  }
  0x39   :  { %v1159_v11 = vld [vmem:[#allocation7 + $0xa8] ss:$12 sps:$4 sm:$0xff]   ;;  %573 = vmatprep.subr.bf16.mxu1 %v1157_v10  ;;  %v1147_v13 = vld [vmem:[#allocation5 + $0x30] ss:$8 sps:$4 sm:$0xff]   ;;  %v1148_v16 = vld [vmem:[#allocation5 + $0x24] ss:$8 sps:$4 sm:$0xff]  }
  0x3a   :  { %v1160_v12 = vld [vmem:[#allocation7 + $0x94] ss:$12 sps:$4 sm:$0xff]   ;;  %574 = vmatpush1.bf16.msra.mxu1 %v1159_v11  ;;  %v1162_v14 = vld [vmem:[#allocation7 + $0x90] ss:$12 sps:$4 sm:$0xff]   ;;  %v1165_v18 = vld [vmem:[#allocation7 + $0x78] ss:$12 sps:$4 sm:$0xff]  }
  0x3b   :  { %194 = vmatpush1.bf16.msra.mxu0 %v1138_v4  ;;  %575 = vmatprep.subr.bf16.mxu1 %v1160_v12  ;;  %v1163_v15 = vld [vmem:[#allocation7 + $0x7c] ss:$12 sps:$4 sm:$0xff]   ;;  %v1166_v19 = vld [vmem:[#allocation7 + $0x64] ss:$12 sps:$4 sm:$0xff]   ;;  %v1168_v21 = vld [vmem:[#allocation7 + $0x60] ss:$12 sps:$4 sm:$0xff]  }
  0x3c   :  { %195 = vmatprep.subr.bf16.mxu0 %v1139_v5  ;;  %v1150_v17 = vld [vmem:[#allocation5 + $0x20] ss:$8 sps:$4 sm:$0xff]   ;;  %v1151_v20 = vld [vmem:[#allocation5 + $0x14] ss:$8 sps:$4 sm:$0xff]   ;;  %v1153_v22 = vld [vmem:[#allocation5 + $0x10] ss:$8 sps:$4 sm:$0xff]   ;;  %v101_v5 = vlaneseq }
  0x3d   :  { %v1169_v23 = vld [vmem:[#allocation7 + $0x4c] ss:$12 sps:$4 sm:$0xff]   ;;  %v1156_v25 = vld [vmem:[#allocation5] ss:$8 sps:$4 sm:$0xff]   ;;  %v1183_v29 = vld [vmem:[#allocation7 + $0x170] ss:$12 sps:$4 sm:$0xff]  }
  0x3e   :  { %576 = vmatpush1.bf16.msra.mxu1 %v1162_v14  ;;  %v1154_v24 = vld [vmem:[#allocation5 + $0x4] ss:$8 sps:$4 sm:$0xff]   ;;  %v81_v26 = vld [vmem:[#allocation2] sm:$0xff]  ;;  %v1171_v27 = vld [vmem:[#allocation7 + $0x48] ss:$12 sps:$4 sm:$0xff]   ;;  %v1364_v4 = vmov 0.0  }
  0x3f   :  { %196 = vmatpush1.bf16.msra.mxu0 %v1141_v6  ;;  %577 = vmatprep.subr.bf16.mxu1 %v1163_v15  ;;  %v1172_v28 = vld [vmem:[#allocation7 + $0x34] ss:$12 sps:$4 sm:$0xff]   ;;  %v82_v30 = vpack.c.bf16 %v81_v26, %v81_v26  ;;  %v1174_v31 = vld [vmem:[#allocation7 + $0x30] ss:$12 sps:$4 sm:$0xff]   ;;  %v1188_v34 = vld [vmem:[#allocation7 + $0x158] ss:$12 sps:$4 sm:$0xff]  }
  0x40   :  { %197 = vmatprep.subr.bf16.mxu0 %v1142_v7  ;;  %v1175_v32 = vld [vmem:[#allocation7 + $0x1c] ss:$12 sps:$4 sm:$0xff]   ;;  %v1177_v35 = vld [vmem:[#allocation7 + $0x18] ss:$12 sps:$4 sm:$0xff]   ;;  %v1193_v38 = vld [vmem:[#allocation7 + $0x140] ss:$12 sps:$4 sm:$0xff]  }
  0x41   :  { %v1185_v33 = vld [vmem:[#allocation7 + $0xb0] ss:$12 sps:$4 sm:$0xff]   ;;  %v1190_v37 = vld [vmem:[#allocation7 + $0x98] ss:$12 sps:$4 sm:$0xff]   ;;  %v1180_v39 = vld [vmem:[#allocation7] ss:$12 sps:$4 sm:$0xff]  }
  0x42   :  { %578 = vmatpush1.bf16.msra.mxu1 %v1165_v18  ;;  %v1178_v36 = vld [vmem:[#allocation7 + $0x4] ss:$12 sps:$4 sm:$0xff]   ;;  %v1181_v40 = vld [vmem:[#allocation7 + $0x16c] ss:$12 sps:$4 sm:$0xff]   ;;  %v1184_v42 = vld [vmem:[#allocation7 + $0x168] ss:$12 sps:$4 sm:$0xff]  }
  0x43   :  { %198 = vmatpush1.bf16.msra.mxu0 %v1144_v8  ;;  %579 = vmatprep.subr.bf16.mxu1 %v1166_v19  ;;  %v1195_v41 = vld [vmem:[#allocation7 + $0x80] ss:$12 sps:$4 sm:$0xff]   ;;  %v1198_v43 = vld [vmem:[#allocation7 + $0x128] ss:$12 sps:$4 sm:$0xff]   ;;  %v1203_v46 = vld [vmem:[#allocation7 + $0x110] ss:$12 sps:$4 sm:$0xff]  }
  0x44   :  { %199 = vmatprep.subr.bf16.mxu0 %v1145_v9  ;;  %v1186_v44 = vld [vmem:[#allocation7 + $0x154] ss:$12 sps:$4 sm:$0xff]   ;;  %v1189_v47 = vld [vmem:[#allocation7 + $0x150] ss:$12 sps:$4 sm:$0xff]   ;;  %v1208_v50 = vld [vmem:[#allocation7 + $0xf8] ss:$12 sps:$4 sm:$0xff]  }
  0x45   :  { %v1200_v45 = vld [vmem:[#allocation7 + $0x68] ss:$12 sps:$4 sm:$0xff]   ;;  %v1205_v49 = vld [vmem:[#allocation7 + $0x50] ss:$12 sps:$4 sm:$0xff]   ;;  %v1194_v51 = vld [vmem:[#allocation7 + $0x138] ss:$12 sps:$4 sm:$0xff]  }
  0x46   :  { %580 = vmatpush1.bf16.msra.mxu1 %v1168_v21  ;;  %v1191_v48 = vld [vmem:[#allocation7 + $0x13c] ss:$12 sps:$4 sm:$0xff]   ;;  %v1196_v52 = vld [vmem:[#allocation7 + $0x124] ss:$12 sps:$4 sm:$0xff]   ;;  %v1199_v54 = vld [vmem:[#allocation7 + $0x120] ss:$12 sps:$4 sm:$0xff]  }
  0x47   :  { %200 = vmatpush1.bf16.msra.mxu0 %v1147_v13  ;;  %581 = vmatprep.subr.bf16.mxu1 %v1169_v23  ;;  %v1210_v53 = vld [vmem:[#allocation7 + $0x38] ss:$12 sps:$4 sm:$0xff]   ;;  %v1204_v56 = vld [vmem:[#allocation7 + $0x108] ss:$12 sps:$4 sm:$0xff]   ;;  %v1209_v58 = vld [vmem:[#allocation7 + $0xf0] ss:$12 sps:$4 sm:$0xff]  }
  0x48   :  { %201 = vmatprep.subr.bf16.mxu0 %v1148_v16  ;;  %v1201_v55 = vld [vmem:[#allocation7 + $0x10c] ss:$12 sps:$4 sm:$0xff]   ;;  %v1206_v57 = vld [vmem:[#allocation7 + $0xf4] ss:$12 sps:$4 sm:$0xff]   ;;  %v1211_v59 = vld [vmem:[#allocation7 + $0xdc] ss:$12 sps:$4 sm:$0xff]  }
  0x49   :  { %v1213_v60 = vld [vmem:[#allocation7 + $0xe0] ss:$12 sps:$4 sm:$0xff]   ;;  %v1214_v61 = vld [vmem:[#allocation7 + $0xd8] ss:$12 sps:$4 sm:$0xff]   ;;  %v1218_v0 = vld [vmem:[#allocation7 + $0xc8] ss:$12 sps:$4 sm:$0xff]  }
  0x4a   :  { %582 = vmatpush1.bf16.msra.mxu1 %v1171_v27  ;;  %v1215_v62 = vld [vmem:[#allocation7 + $0x20] ss:$12 sps:$4 sm:$0xff]   ;;  %v1216_v63 = vld [vmem:[#allocation7 + $0xc4] ss:$12 sps:$4 sm:$0xff]   ;;  %v1220_v2 = vld [vmem:[#allocation7 + $0x8] ss:$12 sps:$4 sm:$0xff]  }
  0x4b   :  { %202 = vmatpush1.bf16.msra.mxu0 %v1150_v17  ;;  %583 = vmatprep.subr.bf16.mxu1 %v1172_v28  ;;  %v1219_v1 = vld [vmem:[#allocation7 + $0xc0] ss:$12 sps:$4 sm:$0xff]   ;;  %v1221_v3 = vld [vmem:[#allocation8 + $0x78] sm:$0xff]   ;;  %v1420_v6 = vshrl.u32 %v101_v5, 7  ;;  %v1226_v26 = vld [vmem:[#allocation8 + $0xb0] sm:$0xff]   ;;  %s1366_s27 = smov [#allocation10]  }
  0x4c   :  { %203 = vmatprep.subr.bf16.mxu0 %v1151_v20  ;;  %v99_v8 = vld [vmem:[%s1455_s2] sm:$0x3]  ;;  %v1227_v27 = vld [vmem:[#allocation8 + $0x68] sm:$0xff]   ;;  %s946_s28 = sshll.u32 %s1366_s27, 4  ;;  %s947_s28 = int_to_ptr.vmem [resolvable:$true] %s946_s28 }
  0x4d   :  { %v103_v7 = vsub.s32 0, %v1420_v6  ;;  %v107_v9 = vsub.s32 1, %v1420_v6  ;;  %v1222_v21 = vld [vmem:[#allocation8 + $0x38] sm:$0xff]   ;;  %v1228_v28 = vld [vmem:[#allocation8 + $0x28] sm:$0xff]   ;;  %s1325_s29 = scalar_lea.vmem %s947_s28, 128  ;;  %p1330_p7 = scmp.lt.s32.totalorder %s947_s28, %s947_s28 }
  0x4e   :  { %584 = vmatpush1.bf16.msra.mxu1 %v1174_v31  ;;  %v1231_v31 = vld [vmem:[#allocation8 + $0x20] sm:$0xff]   ;;  %p1326_p6 = scmp.ne.s32.totalorder %s947_s28, %s1325_s29  ;;  %p1331_p8 = scmp.lt.s32.totalorder %s1325_s29, %s1325_s29 }
  0x4f   :  { %204 = vmatpush1.bf16.msra.mxu0 %v1153_v22  ;;  %585 = vmatprep.subr.bf16.mxu1 %v1175_v32  ;;  %v104_v10 = vrot.slane %v99_v8, %v103_v7  ;;  %v108_v11 = vrot.slane %v99_v8, %v107_v9  ;;  %v1223_v22 = vld [vmem:[#allocation8 + $0xb8] sm:$0xff]   ;;  %v1232_v32 = vld [vmem:[#allocation8 + $0xa0] sm:$0xff]  }
  0x50   :  { %205 = vmatprep.subr.bf16.mxu0 %v1154_v24  ;;  %v1224_v24 = vld [vmem:[#allocation8 + $0x70] sm:$0xff]   ;;  %p1332_p9 = por %p1331_p8, %p1330_p7 }
  0x52   :  { %586 = vmatpush1.bf16.msra.mxu1 %v1177_v35  ;;  %v1235_v35 = vld [vmem:[#allocation8 + $0x98] sm:$0xff]   ;;  %p1333_p10 = pnand %p1332_p9, %p1326_p6 }
  0x53   :  { %206 = vmatpush1.bf16.msra.mxu0 %v1156_v25  ;;  %587 = vmatprep.subr.bf16.mxu1 %v1178_v36  ;;  %v1225_v25 = vld [vmem:[#allocation8 + $0x30] sm:$0xff]  }
  0x54   :  { %1046 = vmatprep.subr.bf16.mxu0 %v1183_v29  ;;  %v1229_v29 = vld [vmem:[#allocation8 + $0xa8] sm:$0xff]   ;;  %v1236_v36 = vld [vmem:[#allocation8 + $0x50] sm:$0xff]  }
  0x56   :  { %224 = vmatmul.mubr.bf16.vlgmr.msra.gmra.mxu0 %v82_v30  ;;  %588 = vmatpush1.bf16.msra.mxu1 %v1180_v39  ;;  %v1230_v30 = vld [vmem:[#allocation8 + $0x60] sm:$0xff]   ;;  %v1239_v39 = vld [vmem:[#allocation8 + $0x48] sm:$0xff]  }
  0x57   :  { %1047 = vmatpush3.bf16.msra.mxu0 %v1185_v33  ;;  %589 = vmatprep.subr.bf16.mxu1 %v1181_v40  ;;  %v1233_v33 = vld [vmem:[#allocation8 + $0x58] sm:$0xff]   ;;  %v1240_v40 = vld [vmem:[#allocation8 + $0x8] sm:$0xff]  }
  0x58   :  { %1048 = vmatprep.subr.bf16.mxu0 %v1188_v34  ;;  %v1234_v34 = vld [vmem:[#allocation8 + $0x18] sm:$0xff]  }
  0x5a   :  { %590 = vmatpush2.bf16.msra.mxu1 %v1184_v42  ;;  %v1242_v42 = vld [vmem:[#allocation8 + $0x40] sm:$0xff]  }
  0x5b   :  { %1049 = vmatpush3.bf16.msra.mxu0 %v1190_v37  ;;  %591 = vmatprep.subr.bf16.mxu1 %v1186_v44  ;;  %v1237_v37 = vld [vmem:[#allocation8 + $0x10] sm:$0xff]   ;;  %v1244_v44 = vld [vmem:[#allocation8 + $0x80] sm:$0xff]  }
  0x5c   :  { %1050 = vmatprep.subr.bf16.mxu0 %v1193_v38  ;;  %v1238_v38 = vld [vmem:[#allocation8 + $0x90] sm:$0xff]  }
  0x5e   :  { %592 = vmatpush2.bf16.msra.mxu1 %v1189_v47  ;;  %v312_v47 = vsub.s32 2, %v1420_v6  ;;  %v1021_v6 = vld [vmem:[%s1459_s6] ss:$0 sm:$0xff] }
  0x5f   :  { %1051 = vmatpush3.bf16.msra.mxu0 %v1195_v41  ;;  %593 = vmatprep.subr.bf16.mxu1 %v1191_v48  ;;  %v1241_v41 = vld [vmem:[#allocation8 + $0x88] sm:$0xff]  }
  0x60   :  { %1052 = vmatprep.subr.bf16.mxu0 %v1198_v43  ;;  %v1243_v43 = vld [vmem:[#allocation8] sm:$0xff]  }
  0x62   :  { %594 = vmatpush2.bf16.msra.mxu1 %v1194_v51 }
  0x63   :  { %1053 = vmatpush3.bf16.msra.mxu0 %v1200_v45  ;;  %595 = vmatprep.subr.bf16.mxu1 %v1196_v52  ;;  %v300_v45 = vld [vmem:[%s1457_s4] sm:$0x7] }
  0x64   :  { %1054 = vmatprep.subr.bf16.mxu0 %v1203_v46  ;;  %v305_v46 = vrot.slane %v300_v45, %v103_v7  ;;  %v309_v48 = vrot.slane %v300_v45, %v107_v9  ;;  %v313_v52 = vrot.slane %v300_v45, %v312_v47 }
  0x66   :  { %596 = vmatpush2.bf16.msra.mxu1 %v1199_v54 }
  0x67   :  { %1055 = vmatpush3.bf16.msra.mxu0 %v1205_v49  ;;  %597 = vmatprep.subr.bf16.mxu1 %v1201_v55 }
  0x68   :  { %1056 = vmatprep.subr.bf16.mxu0 %v1208_v50 }
  0x6a   :  { %598 = vmatpush2.bf16.msra.mxu1 %v1204_v56 }
  0x6b   :  { %1057 = vmatpush3.bf16.msra.mxu0 %v1210_v53  ;;  %599 = vmatprep.subr.bf16.mxu1 %v1206_v57 }
  0x6c   :  { %1058 = vmatprep.subr.bf16.mxu0 %v1213_v60 }
  0x6e   :  { %600 = vmatpush2.bf16.msra.mxu1 %v1209_v58 }
  0x6f   :  { %601 = vmatprep.subr.bf16.mxu1 %v1211_v59  ;;  %1059 = vmatpush3.bf16.msra.mxu0 %v1215_v62 }
  0x70   :  { %1060 = vmatprep.subr.bf16.mxu0 %v1218_v0 }
  0x72   :  { %602 = vmatpush2.bf16.msra.mxu1 %v1214_v61 }
  0x73   :  { %603 = vmatprep.subr.bf16.mxu1 %v1216_v63  ;;  %1061 = vmatpush3.bf16.msra.mxu0 %v1220_v2 }
  0x74   :  { %1068 = vmatprep.subr.bf16.mxu0 %v1221_v3 }
  0x76   :  { %604 = vmatpush2.bf16.msra.mxu1 %v1219_v1 }
  0x77   :  { %1099 = vmatprep.subr.bf16.mxu1 %v1364_v4 }
 0x116   :  { %v225_v12 = vpop.f32.mrf.mxu0 }
 0x117   :  { %v226_v13 = vadd.f32 %v225_v12, %v104_v10 }
 0x118   :  { %v227_v14 = vpop.f32.mrf.mxu0 }
 0x119   :  { %v228_v15 = vadd.f32 %v227_v14, %v108_v11  ;;  %v232_v16 = vmax.f32 %v226_v13, 0.0 }
 0x11a   :  { %v229_v17 = vpop.f32.mrf.mxu0 }
 0x11b   :  { %v233_v18 = vmax.f32 %v228_v15, 0.0  ;;  %v234_v23 = vpack.c.bf16 %v232_v16, %v232_v16 }
 0x11c   :  { %v230_v19 = vpop.f32.mrf.mxu0 }
 0x11d   :  { %v235_v20 = vpack.c.bf16 %v233_v18, %v233_v18 }
 0x11f   :  { %605 = vmatprep.mubr.bf16.mxu1 %v235_v20  ;;  %646 = vmatprep.mubr.bf16.mxu0 %v235_v20 }
 0x120   :  { %606 = vmatmul.mubr.bf16.vlgmr.msra.gmra.mxu1 %v234_v23  ;;  %647 = vmatmul.mubr.bf16.vlgmr.msra.gmra.mxu0 %v234_v23 }
 0x121   :  { %1069 = vmatpush3.bf16.msra.mxu0 %v1222_v21  ;;  %1100 = vmatpush3.bf16.msra.mxu1 %v1223_v22 }
 0x122   :  { %1070 = vmatprep.subr.bf16.mxu0 %v1224_v24  ;;  %1101 = vmatprep.subr.bf16.mxu1 %v1364_v4 }
 0x123   :  { %1115 = vmatprep.mubr.msk.bf16.mxu1 %vm1365_vm0, %v1364_v4 }
 0x125   :  { %1071 = vmatpush3.bf16.msra.mxu0 %v1225_v25  ;;  %1102 = vmatpush3.bf16.msra.mxu1 %v1226_v26 }
 0x126   :  { %1072 = vmatprep.subr.bf16.mxu0 %v1227_v27  ;;  %1103 = vmatprep.subr.bf16.mxu1 %v1364_v4 }
 0x129   :  { %1073 = vmatpush3.bf16.msra.mxu0 %v1228_v28  ;;  %1104 = vmatpush3.bf16.msra.mxu1 %v1229_v29 }
 0x12a   :  { %1074 = vmatprep.subr.bf16.mxu0 %v1230_v30  ;;  %1105 = vmatprep.subr.bf16.mxu1 %v1364_v4 }
 0x12d   :  { %1075 = vmatpush3.bf16.msra.mxu0 %v1231_v31  ;;  %1106 = vmatpush3.bf16.msra.mxu1 %v1232_v32 }
 0x12e   :  { %1076 = vmatprep.subr.bf16.mxu0 %v1233_v33  ;;  %1107 = vmatprep.subr.bf16.mxu1 %v1364_v4 }
 0x131   :  { %1077 = vmatpush3.bf16.msra.mxu0 %v1234_v34  ;;  %1108 = vmatpush3.bf16.msra.mxu1 %v1235_v35 }
 0x132   :  { %1078 = vmatprep.subr.bf16.mxu0 %v1236_v36  ;;  %1109 = vmatprep.subr.bf16.mxu1 %v1364_v4 }
 0x135   :  { %1079 = vmatpush3.bf16.msra.mxu0 %v1237_v37  ;;  %1110 = vmatpush3.bf16.msra.mxu1 %v1238_v38 }
 0x136   :  { %1111 = vmatprep.subr.bf16.mxu1 %v1364_v4  ;;  %1080 = vmatprep.subr.bf16.mxu0 %v1239_v39 }
 0x139   :  { %1081 = vmatpush3.bf16.msra.mxu0 %v1240_v40  ;;  %1112 = vmatpush3.bf16.msra.mxu1 %v1241_v41 }
 0x13a   :  { %1113 = vmatprep.subr.bf16.mxu1 %v1364_v4  ;;  %1082 = vmatprep.subr.bf16.mxu0 %v1242_v42 }
 0x13d   :  { %1083 = vmatpush3.bf16.msra.mxu0 %v1243_v43  ;;  %1114 = vmatpush3.bf16.msra.mxu1 %v1244_v44 }
 0x1e0   :  { %v607_v49 = vpop.f32.mrf.mxu1  ;;  %v1062_v50 = vpop.f32.mrf.mxu0 }
 0x1e1   :  { %v608_v51 = vadd.f32 %v607_v49, %v305_v46 }
 0x1e2   :  { %v609_v53 = vpop.f32.mrf.mxu1  ;;  %v1063_v54 = vpop.f32.mrf.mxu0 }
 0x1e3   :  { %v610_v55 = vadd.f32 %v609_v53, %v309_v48  ;;  %v1064_v56 = vadd.f32 %v1063_v54, %v1062_v50  ;;  %v654_v57 = vmax.f32 %v608_v51, 0.0 }
 0x1e4   :  { %v611_v58 = vpop.f32.mrf.mxu1  ;;  %v1065_v59 = vpop.f32.mrf.mxu0 }
 0x1e5   :  { %v655_v60 = vmax.f32 %v610_v55, 0.0  ;;  %v649_v61 = vadd.f32 %v1064_v56, %v313_v52  ;;  %v657_v2 = vpack.c.bf16 %v654_v57, %v654_v57 }
 0x1e6   :  { %v612_v62 = vpop.f32.mrf.mxu1  ;;  %v1066_v63 = vpop.f32.mrf.mxu0 }
 0x1e7   :  { %v658_v0 = vpack.c.bf16 %v655_v60, %v655_v60  ;;  %v656_v1 = vmax.f32 %v649_v61, 0.0 }
 0x1e9   :  { %v659_v3 = vpack.c.bf16 %v656_v1, %v656_v1  ;;  %891 = vmatprep.mubr.bf16.mxu0 %v658_v0 }
 0x1ea   :  { %892 = vmatmul.mubr.bf16.vlgmr.msra.gmra.mxu0 %v657_v2 }
 0x1eb   :  { %1116 = vmatmul.mubr.bf16.vlgmr.msra.gmra.mxu1 %v659_v3 }
 0x2aa   :  { %v1084_v4 = vpop.f32.mrf.mxu0 }
 0x2ab   :  { %v933_v5 = vpop.f32.mrf.mxu1 }
 0x2ac   :  { %v1085_v7 = vpop.f32.mrf.mxu0 }
 0x2ad   :  { %v1086_v8 = vadd.f32 %v1085_v7, %v1084_v4  ;;  %v1117_v9 = vpop.f32.mrf.mxu1 }
 0x2ae   :  { %v1087_v10 = vpop.f32.mrf.mxu0 }
 0x2af   :  { %v894_v11 = vadd.f32 %v1086_v8, %v1021_v6  ;;  %v936_v12 = vpop.f32.mrf.mxu1 }
 0x2b0   :  { %v1088_v13 = vpop.f32.mrf.mxu0 }
 0x2b1   :  { %v1118_v14 = vpop.f32.mrf.mxu1  ;;  %v934_v15 = vadd.f32 %v933_v5, %v894_v11 }
 0x2b3   :  { %939 = vst [vmem:[#allocation10] sm:$0xff] %v934_v15 }
 0x2b4   :  { %1336 = shalt.err (!%p1333_p10)
}
 0x2b5   :  { %949 = dma.vmem_to_hbm [thread:$0]  %s947_s28, 128, %s1460_s7, [#allocation4]  }
 0x2b6   :  { %1351 = dma.done.wait [#allocation4], 128  }
 0x2b7   :  { %1352 = vsyncadd [#allocation4], 4294967168 }
 0x2b8   :  { %953 = vsyncpa [#allocation3], 1 }
 0x2b9   :  { %954 = vsyncpa [#allocation6], 1 }
 0x2ba   :  { %955 = vsyncpa [#allocation9], 1 }
 0x2bb   :  { %956 = vsyncpa [#allocation4], 1 }

</bundles_post_ra>
